<compile_context>
chip_gen: v5e
topology: v5e:2x2
jax: 0.10.0
libtpu: 0.0.40
codegen_flags: <defaults>
</compile_context>

<pallas_src>
import jax
import jax.numpy as jnp
from jax.experimental import pallas as pl
from jax.experimental.pallas import tpu as pltpu


def ctx_encoder_kernel(ents_ref, params_ref, out_ref):
    ents = ents_ref[...]                          # (B, N, D) f32
    B, N, D = ents.shape
    params = params_ref[...]                      # (D+2, 2H) f32
    H2 = params.shape[1]
    H = H2 // 2

    # Static slices of the packed parameter block (free).
    bp     = params[D:D + 1, 0:H]                 # (1, H)
    br     = params[D:D + 1, H:H2]                # (1, H)
    w_dist = params[D + 1:D + 2, H:H2]            # (1, H)

    # ---- K=D contraction, unrolled on the VPU with the COMBINED weight ----
    # acc[..., :H] = ents @ Wp, acc[..., H:] = ents @ Wr[:D]; each channel's
    # lane-broadcast happens once for both projections.
    acc = jnp.zeros((B, N, H2), jnp.float32)
    e_chan = []
    for d in range(D):
        e_d = ents[:, :, d:d + 1]                 # (B, N, 1)
        if d < 2:
            e_chan.append(e_d)                    # reuse for the distance term
        acc = acc + e_d * params[d:d + 1, :]      # (B, N, 2H)

    acc_p = acc[:, :, 0:H]                        # ents @ Wp
    acc_r = acc[:, :, H:H2]                       # ents @ Wr[:D]

    # ---- property encoder: relu(ents @ Wp + bp) ----
    prop = jnp.maximum(acc_p + bp, 0.0)           # (B, N, H)

    # ---- pairwise distance on channels 0/1 (reference uses exactly these) ----
    x = e_chan[0][:, :, 0]                        # (B, N)
    y = e_chan[1][:, :, 0]
    dx = x[:, :, None] - x[:, None, :]            # (B, N, N)
    dy = y[:, :, None] - y[:, None, :]
    dist = jnp.sqrt(dx * dx + dy * dy)            # (B, N, N)

    # ---- relation encoder, factored through linearity ----
    #   pre_ij = (acc_r_i - acc_r_j) + dist_ij * Wr[D] + br
    # TODO(synk): for large N, chunk the j axis (lax.fori_loop over Tj blocks)
    # so only a (B, N, Tj, H) slab is live instead of the full (B, N, N, H).
    rel = acc_r[:, :, None, :] - acc_r[:, None, :, :]      # (B, N, N, H)
    rel = rel + dist[:, :, :, None] * w_dist
    rel = jnp.maximum(rel + br, 0.0)
    # i==j pairs were skipped in the reference; at i==j the pre-activation is
    # exactly br, so subtract relu(br) once instead of masking.
    rel_sum = jnp.sum(rel, axis=2) - jnp.maximum(br, 0.0)  # (B, N, H)

    # Fused channel concat: single full-ref store of (B, N, 2H).
    out_ref[...] = jnp.concatenate([prop, rel_sum], axis=-1)


def pack_params(params):
    """Build the single (D+2, 2H) parameter block (call once, outside jit)."""
    wp, bp, wr, br = params["wp"], params["bp"], params["wr"], params["br"]
    D, H = wp.shape
    w_comb = jnp.concatenate([wp, wr[:D, :]], axis=1)                  # (D, 2H)
    b_row = jnp.concatenate([bp, br], axis=1)                          # (1, 2H)
    d_row = jnp.concatenate([jnp.zeros_like(bp), wr[D:D + 1, :]], 1)   # (1, 2H)
    return jnp.concatenate([w_comb, b_row, d_row], axis=0).astype(jnp.float32)


def attention_context_encoder(ctx, param_block, num_ent, dim_ent):
    B = ctx.shape[0]
    ents = ctx.reshape(B, num_ent, dim_ent).astype(jnp.float32)
    H2 = param_block.shape[1]
    # TODO(synk): if B grows, add grid=(pl.cdiv(B, B_blk),) with
    # dimension_semantics=("parallel",) to use both v7x TensorCores, sizing
    # B_blk * N^2 * H * 4 (x2 double-buffer) for v7x's 64 MiB VMEM.
    return pl.pallas_call(
        ctx_encoder_kernel,
        out_shape=jax.ShapeDtypeStruct((B, num_ent, H2), jnp.float32),
        in_specs=[
            pl.BlockSpec(memory_space=pltpu.MemorySpace.VMEM),
            pl.BlockSpec(memory_space=pltpu.MemorySpace.VMEM),
        ],
        out_specs=pl.BlockSpec(memory_space=pltpu.MemorySpace.VMEM),
    )(ents, param_block)


def reference(ctx, params, num_ent, dim_ent):
    """Pure-JAX mirror of the PyTorch forward (dropout = identity)."""
    B = ctx.shape[0]
    ents = ctx.reshape(B, num_ent, dim_ent)
    prop = jax.nn.relu(ents @ params["wp"] + params["bp"])
    diff = ents[:, :, None, :] - ents[:, None, :, :]
    dist = jnp.sqrt(diff[..., 0] ** 2 + diff[..., 1] ** 2)
    feat = jnp.concatenate([diff, dist[..., None]], axis=-1)
    rel = jax.nn.relu(feat @ params["wr"] + params["br"])
    mask = (1.0 - jnp.eye(num_ent))[None, :, :, None]
    rel_sum = (rel * mask).sum(axis=2)
    return jnp.concatenate([prop, rel_sum], axis=-1)


if __name__ == "__main__":
    # num_ent entities of dim_ent features; each encoder outputs H = nembed_ctx // 2.
    B = 2
    NUM_ENT = 7
    DIM_ENT = 4
    NEMBED_CTX = 64
    H = NEMBED_CTX // 2

    key = jax.random.PRNGKey(0)
    k_ctx, k_wp, k_bp, k_wr, k_br = jax.random.split(key, 5)

    ctx = jax.random.normal(k_ctx, (B, NUM_ENT * DIM_ENT), dtype=jnp.float32)

    # torch.nn.Linear weights are (out, in); we store the transposed (in, out)
    # layout so `x @ W` applies them.
    params = {
        "wp": 0.5 * jax.random.normal(k_wp, (DIM_ENT, H), dtype=jnp.float32),
        "bp": 0.1 * jax.random.normal(k_bp, (1, H), dtype=jnp.float32),
        "wr": 0.5 * jax.random.normal(k_wr, (DIM_ENT + 1, H), dtype=jnp.float32),
        "br": 0.1 * jax.random.normal(k_br, (1, H), dtype=jnp.float32),
    }

    # Pack the four parameter tensors into one block, once, at init time.
    param_block = jax.block_until_ready(pack_params(params))

    out = attention_context_encoder(ctx, param_block, NUM_ENT, DIM_ENT)
    out = jax.block_until_ready(out)

    ref = reference(ctx, params, NUM_ENT, DIM_ENT)
    assert out.shape == (B, NUM_ENT, NEMBED_CTX), out.shape
    assert jnp.allclose(out, ref, atol=1e-5, rtol=1e-5), float(jnp.abs(out - ref).max())

    print("KERNEL_OK")
</pallas_src>

<mosaic_0001>
module attributes {stable_mosaic.version = 11 : i64} {
  func.func @ctx_encoder_kernel(%arg0: memref<2x7x4xf32, #tpu.memory_space<vmem>>, %arg1: memref<6x64xf32, #tpu.memory_space<vmem>>, %arg2: memref<2x7x64xf32, #tpu.memory_space<vmem>>) attributes {dimension_semantics = [], scalar_prefetch = 0 : i64, scratch_operands = 0 : i64, tpu.core_type = #tpu.core_type<tc>} {
    %c0 = arith.constant 0 : index
    %c0_0 = arith.constant 0 : index
    %c0_1 = arith.constant 0 : index
    %0 = vector.load %arg0[%c0, %c0_0, %c0_1] : memref<2x7x4xf32, #tpu.memory_space<vmem>>, vector<2x7x4xf32>
    %c0_2 = arith.constant 0 : index
    %c0_3 = arith.constant 0 : index
    %1 = vector.load %arg1[%c0_2, %c0_3] : memref<6x64xf32, #tpu.memory_space<vmem>>, vector<6x64xf32>
    %2 = vector.extract_strided_slice %1 {offsets = [4, 0], sizes = [1, 32], strides = [1, 1]} : vector<6x64xf32> to vector<1x32xf32>
    %3 = vector.extract_strided_slice %1 {offsets = [4, 32], sizes = [1, 32], strides = [1, 1]} : vector<6x64xf32> to vector<1x32xf32>
    %4 = vector.extract_strided_slice %1 {offsets = [5, 32], sizes = [1, 32], strides = [1, 1]} : vector<6x64xf32> to vector<1x32xf32>
    %cst = arith.constant 0.000000e+00 : f32
    %5 = vector.broadcast %cst : f32 to vector<2x7x64xf32>
    %6 = vector.extract_strided_slice %0 {offsets = [0, 0, 0], sizes = [2, 7, 1], strides = [1, 1, 1]} : vector<2x7x4xf32> to vector<2x7x1xf32>
    %7 = vector.extract_strided_slice %1 {offsets = [0, 0], sizes = [1, 64], strides = [1, 1]} : vector<6x64xf32> to vector<1x64xf32>
    %8 = vector.shape_cast %7 : vector<1x64xf32> to vector<1x1x64xf32>
    %9 = vector.broadcast %6 : vector<2x7x1xf32> to vector<2x7x64xf32>
    %10 = vector.broadcast %8 : vector<1x1x64xf32> to vector<2x7x64xf32>
    %11 = arith.mulf %9, %10 : vector<2x7x64xf32>
    %12 = arith.addf %5, %11 : vector<2x7x64xf32>
    %13 = vector.extract_strided_slice %0 {offsets = [0, 0, 1], sizes = [2, 7, 1], strides = [1, 1, 1]} : vector<2x7x4xf32> to vector<2x7x1xf32>
    %14 = vector.extract_strided_slice %1 {offsets = [1, 0], sizes = [1, 64], strides = [1, 1]} : vector<6x64xf32> to vector<1x64xf32>
    %15 = vector.shape_cast %14 : vector<1x64xf32> to vector<1x1x64xf32>
    %16 = vector.broadcast %13 : vector<2x7x1xf32> to vector<2x7x64xf32>
    %17 = vector.broadcast %15 : vector<1x1x64xf32> to vector<2x7x64xf32>
    %18 = arith.mulf %16, %17 : vector<2x7x64xf32>
    %19 = arith.addf %12, %18 : vector<2x7x64xf32>
    %20 = vector.extract_strided_slice %0 {offsets = [0, 0, 2], sizes = [2, 7, 1], strides = [1, 1, 1]} : vector<2x7x4xf32> to vector<2x7x1xf32>
    %21 = vector.extract_strided_slice %1 {offsets = [2, 0], sizes = [1, 64], strides = [1, 1]} : vector<6x64xf32> to vector<1x64xf32>
    %22 = vector.shape_cast %21 : vector<1x64xf32> to vector<1x1x64xf32>
    %23 = vector.broadcast %20 : vector<2x7x1xf32> to vector<2x7x64xf32>
    %24 = vector.broadcast %22 : vector<1x1x64xf32> to vector<2x7x64xf32>
    %25 = arith.mulf %23, %24 : vector<2x7x64xf32>
    %26 = arith.addf %19, %25 : vector<2x7x64xf32>
    %27 = vector.extract_strided_slice %0 {offsets = [0, 0, 3], sizes = [2, 7, 1], strides = [1, 1, 1]} : vector<2x7x4xf32> to vector<2x7x1xf32>
    %28 = vector.extract_strided_slice %1 {offsets = [3, 0], sizes = [1, 64], strides = [1, 1]} : vector<6x64xf32> to vector<1x64xf32>
    %29 = vector.shape_cast %28 : vector<1x64xf32> to vector<1x1x64xf32>
    %30 = vector.broadcast %27 : vector<2x7x1xf32> to vector<2x7x64xf32>
    %31 = vector.broadcast %29 : vector<1x1x64xf32> to vector<2x7x64xf32>
    %32 = arith.mulf %30, %31 : vector<2x7x64xf32>
    %33 = arith.addf %26, %32 : vector<2x7x64xf32>
    %34 = vector.extract_strided_slice %33 {offsets = [0, 0, 0], sizes = [2, 7, 32], strides = [1, 1, 1]} : vector<2x7x64xf32> to vector<2x7x32xf32>
    %35 = vector.extract_strided_slice %33 {offsets = [0, 0, 32], sizes = [2, 7, 32], strides = [1, 1, 1]} : vector<2x7x64xf32> to vector<2x7x32xf32>
    %36 = vector.shape_cast %2 : vector<1x32xf32> to vector<1x1x32xf32>
    %37 = vector.broadcast %36 : vector<1x1x32xf32> to vector<2x7x32xf32>
    %38 = arith.addf %34, %37 : vector<2x7x32xf32>
    %cst_4 = arith.constant 0.000000e+00 : f32
    %39 = vector.broadcast %cst_4 : f32 to vector<2x7x32xf32>
    %40 = arith.maximumf %38, %39 : vector<2x7x32xf32>
    %41 = vector.shape_cast %6 : vector<2x7x1xf32> to vector<2x7xf32>
    %42 = vector.shape_cast %13 : vector<2x7x1xf32> to vector<2x7xf32>
    %43 = vector.shape_cast %41 : vector<2x7xf32> to vector<2x7x1xf32>
    %44 = vector.shape_cast %41 : vector<2x7xf32> to vector<2x1x7xf32>
    %45 = vector.broadcast %43 : vector<2x7x1xf32> to vector<2x7x7xf32>
    %46 = vector.broadcast %44 : vector<2x1x7xf32> to vector<2x7x7xf32>
    %47 = arith.subf %45, %46 : vector<2x7x7xf32>
    %48 = vector.shape_cast %42 : vector<2x7xf32> to vector<2x7x1xf32>
    %49 = vector.shape_cast %42 : vector<2x7xf32> to vector<2x1x7xf32>
    %50 = vector.broadcast %48 : vector<2x7x1xf32> to vector<2x7x7xf32>
    %51 = vector.broadcast %49 : vector<2x1x7xf32> to vector<2x7x7xf32>
    %52 = arith.subf %50, %51 : vector<2x7x7xf32>
    %53 = arith.mulf %47, %47 : vector<2x7x7xf32>
    %54 = arith.mulf %52, %52 : vector<2x7x7xf32>
    %55 = arith.addf %53, %54 : vector<2x7x7xf32>
    %56 = math.sqrt %55 : vector<2x7x7xf32>
    %57 = vector.shape_cast %35 : vector<2x7x32xf32> to vector<2x7x1x32xf32>
    %58 = vector.shape_cast %35 : vector<2x7x32xf32> to vector<2x1x7x32xf32>
    %59 = vector.broadcast %57 : vector<2x7x1x32xf32> to vector<2x7x7x32xf32>
    %60 = vector.broadcast %58 : vector<2x1x7x32xf32> to vector<2x7x7x32xf32>
    %61 = arith.subf %59, %60 : vector<2x7x7x32xf32>
    %62 = vector.shape_cast %56 : vector<2x7x7xf32> to vector<2x7x7x1xf32>
    %63 = vector.shape_cast %4 : vector<1x32xf32> to vector<1x1x1x32xf32>
    %64 = vector.broadcast %62 : vector<2x7x7x1xf32> to vector<2x7x7x32xf32>
    %65 = vector.broadcast %63 : vector<1x1x1x32xf32> to vector<2x7x7x32xf32>
    %66 = arith.mulf %64, %65 : vector<2x7x7x32xf32>
    %67 = arith.addf %61, %66 : vector<2x7x7x32xf32>
    %68 = vector.shape_cast %3 : vector<1x32xf32> to vector<1x1x1x32xf32>
    %69 = vector.broadcast %68 : vector<1x1x1x32xf32> to vector<2x7x7x32xf32>
    %70 = arith.addf %67, %69 : vector<2x7x7x32xf32>
    %cst_5 = arith.constant 0.000000e+00 : f32
    %71 = vector.broadcast %cst_5 : f32 to vector<2x7x7x32xf32>
    %72 = arith.maximumf %70, %71 : vector<2x7x7x32xf32>
    %cst_6 = arith.constant dense<0.000000e+00> : vector<2x7x32xf32>
    %73 = vector.multi_reduction <add>, %72, %cst_6 [2] : vector<2x7x7x32xf32> to vector<2x7x32xf32>
    %cst_7 = arith.constant 0.000000e+00 : f32
    %74 = vector.broadcast %cst_7 : f32 to vector<1x32xf32>
    %75 = arith.maximumf %3, %74 : vector<1x32xf32>
    %76 = vector.shape_cast %75 : vector<1x32xf32> to vector<1x1x32xf32>
    %77 = vector.broadcast %76 : vector<1x1x32xf32> to vector<2x7x32xf32>
    %78 = arith.subf %73, %77 : vector<2x7x32xf32>
    %79 = tpu.concatenate %40, %78 in 2 : vector<2x7x32xf32>, vector<2x7x32xf32> -> vector<2x7x64xf32>
    %c0_8 = arith.constant 0 : index
    %c0_9 = arith.constant 0 : index
    %c0_10 = arith.constant 0 : index
    %80 = vector.load %arg2[%c0_8, %c0_9, %c0_10] : memref<2x7x64xf32, #tpu.memory_space<vmem>>, vector<2x7x64xf32>
    tpu.vector_store %arg2[%c0_8, %c0_9, %c0_10], %79 {strides = array<i32>} : memref<2x7x64xf32, #tpu.memory_space<vmem>>, vector<2x7x64xf32>,
    return
  }
}

</mosaic_0001>

<bundles_post_ra>
// kernel: tpu_custom_call.1
= control target key start
LH: loop header
LB: loop body
LE: loop exit
PB: predicated region body
PF: predicated region fallthrough
CT: control target
= control target key end

     0   :  { %v535_v0 = vmov 1   ;;  %v536_v1 = vmov 0   ;;  %v537_v3 = vmov 2   ;;  %v538_v5 = vmov 3   ;;  %s697_s0 = inlined_call_operand.vmem [shape: f32[2,7,4], index: 0, kind: input, shape index: {}]   ;;  %s698_s1 = inlined_call_operand.vmem [shape: f32[6,64], index: 1, kind: input, shape index: {}]   ;;  %s699_s2 = inlined_call_operand.vmem [shape: f32[2,7,64], index: 2, kind: output, shape index: {}]  }
   0x1   :  { %524 = vset.pattern.permute.xlu1 %v535_v0  ;;  %523 = vset.pattern.permute.xlu0 %v536_v1  ;;  %v11_v2 = vld [vmem:[%s697_s0] sm:$0x7f]  ;;  %v12_v4 = vld [vmem:[%s697_s0 + $0x8] sm:$0x7f]  ;;  %v73_v6 = vlaneseq  ;;  %vm354_vm4 = vcmask 522496   ;;  %vm77_vm5 = vcmask 1041409  }
   0x2   :  { %30 = vperm.xlu1 %524, %v11_v2   ;;  %16 = vperm.xlu0 %523, %v11_v2   ;;  %v563_v8 = vld [vmem:[%s698_s1] sm:$0x3f]  ;;  %vm78_vm6 = vcmask 1042434   ;;  %vm80_vm7 = vcmask 1043459   ;;  %vm82_vm8 = vcmask 1044484   ;;  %vm84_vm9 = vcmask 1045509  }
   0x3   :  { %525 = vset.pattern.permute.xlu2 %v537_v3  ;;  %v201_v7 = vshrl.u32 %v73_v6, 7  ;;  %v37_v9 = vperm.slane %v563_v8, 1  ;;  %v74_v10 = vand.u32 127, %v73_v6  ;;  %v24_v11 = vperm.slane %v563_v8, 0 }
   0x4   :  { %43 = vperm.xlu2 %525, %v11_v2   ;;  %vm86_vm10 = vcmask 1046534   ;;  %vm509_vm11 = vcmask 261120   ;;  %vm512_vm12 = vcmask 522240  }
   0xa   :  { %34 = vperm.xlu1 %524, %v12_v4   ;;  %21 = vperm.xlu0 %523, %v12_v4  }
   0xc   :  { %47 = vperm.xlu2 %525, %v12_v4  }
  0x12   :  { %527 = vset.pattern.permute.xlu1 %v538_v5  ;;  %526 = vset.pattern.permute.xlu0 %v538_v5 }
  0x13   :  { %60 = vperm.xlu1 %527, %v12_v4   ;;  %56 = vperm.xlu0 %526, %v11_v2  }
  0x14   :  { %528 = vset.pattern.permute.xlu2 %v201_v7 }
  0x1b   :  { %529 = vset.pattern.permute.xlu1 %v201_v7  ;;  %530 = vset.pattern.permute.xlu0 %v201_v7 }
  0x5e   :  { %v44_v6 = vpop.permute.xlu2 %43 }
  0x66   :  { %v48_v7 = vpop.permute.xlu2 %47 }
  0x74   :  { %v31_v12 = vpop.permute.xlu1 %30  ;;  %v17_v13 = vpop.permute.xlu0 %16 }
  0x75   :  { %v38_v14 = vmul.f32 %v37_v9, %v31_v12  ;;  %v97_v15 = vperm.slane %v31_v12, %v74_v10  ;;  %v25_v16 = vmul.f32 %v24_v11, %v17_v13  ;;  %v75_v17 = vperm.slane %v17_v13, %v74_v10 }
  0x77   :  { %v111_v18 = vsub.f32 %v31_v12, %v97_v15  ;;  %v95_v19 = vsub.f32 %v17_v13, %v75_v17  ;;  %v567_v20 = vadd.f32 %v38_v14, %v25_v16 }
  0x79   :  { %v115_v21 = vmul.f32 %v111_v18, %v111_v18  ;;  %v113_v22 = vmul.f32 %v95_v19, %v95_v19  ;;  %v577_v18 = vperm.slane %v563_v8, 5 }
  0x7b   :  { %v117_v23 = vadd.f32 %v115_v21, %v113_v22 }
  0x7c   :  { %v35_v24 = vpop.permute.xlu1 %34  ;;  %v22_v25 = vpop.permute.xlu0 %21 }
  0x7d   :  { %531 = vrsqrt.f32 %v117_v23  ;;  %v39_v26 = vmul.f32 %v37_v9, %v35_v24  ;;  %v98_v27 = vperm.slane %v35_v24, %v74_v10  ;;  %v26_v28 = vmul.f32 %v24_v11, %v22_v25 }
  0x7e   :  { %v76_v29 = vperm.slane %v22_v25, %v74_v10  ;;  %vm126_vm0 = vcmp.eq.f32.partialorder %v117_v23, inf  ;;  %v129_v45 = vand.u32 2147483648, %v117_v23  ;;  %vm128_vm1 = vcmp.eq.f32.partialorder %v117_v23, 0.0 }
  0x7f   :  { %v112_v30 = vsub.f32 %v35_v24, %v98_v27  ;;  %v569_v31 = vadd.f32 %v39_v26, %v26_v28  ;;  %v50_v9 = vperm.slane %v563_v8, 2  ;;  %v63_v10 = vperm.slane %v563_v8, 3 }
  0x80   :  { %v96_v32 = vsub.f32 %v22_v25, %v76_v29 }
  0x81   :  { %v116_v33 = vmul.f32 %v112_v30, %v112_v30  ;;  %v51_v13 = vmul.f32 %v50_v9, %v44_v6 }
  0x82   :  { %v114_v34 = vmul.f32 %v96_v32, %v96_v32 }
  0x83   :  { %v532_v35 = vpop.eup %531  ;;  %v53_v15 = vadd.f32 %v51_v13, %v567_v20 }
  0x84   :  { %v118_v36 = vadd.f32 %v116_v33, %v114_v34  ;;  %v120_v37 = vmul.f32 %v532_v35, %v117_v23  ;;  %v589_v34 = vperm.slane %v563_v8, 4 }
  0x85   :  { %v57_v11 = vpop.permute.xlu0 %56  ;;  %v61_v19 = vpop.permute.xlu1 %60 }
  0x86   :  { %533 = vrsqrt.f32 %v118_v36  ;;  %v121_v38 = vmul.f32 %v532_v35, %v120_v37  ;;  %vm138_vm2 = vcmp.eq.f32.partialorder %v118_v36, inf  ;;  %v141_v55 = vand.u32 2147483648, %v118_v36 }
  0x87   :  { %vm140_vm3 = vcmp.eq.f32.partialorder %v118_v36, 0.0  ;;  %v64_v14 = vmul.f32 %v63_v10, %v57_v11  ;;  %v65_v25 = vmul.f32 %v63_v10, %v61_v19 }
  0x88   :  { %v122_v39 = vmul.f32 0.5, %v121_v38 }
  0x89   :  { %v574_v16 = vadd.f32 %v64_v14, %v53_v15 }
  0x8a   :  { %v123_v40 = vsub.f32 1.5, %v122_v39 }
  0x8b   :  { %v157_v21 = vperm.slane %v574_v16, 0  ;;  %v146_v22 = vrot.slane %v574_v16, 2  ;;  %v145_v32 = vrot.slane %v574_v16, 1 }
  0x8c   :  { %v534_v41 = vpop.eup %533  ;;  %v124_v42 = vmul.f32 %v532_v35, %v123_v40 }
  0x8d   :  { %v132_v43 = vmul.f32 %v534_v41, %v118_v36  ;;  %v185_v26 = vsub.f32 %v157_v21, %v574_v16  ;;  %v159_v27 = vperm.slane %v146_v22, 0  ;;  %v158_v39 = vperm.slane %v145_v32, 0 }
  0x8e   :  { %v125_v44 = vmul.f32 %v124_v42, %v117_v23 }
  0x8f   :  { %v133_v46 = vmul.f32 %v534_v41, %v132_v43  ;;  %v187_v35 = vsub.f32 %v159_v27, %v574_v16  ;;  %v149_v43 = vrot.slane %v574_v16, 5 }
  0x90   :  { %v127_v47 = vsel %vm126_vm0, %v117_v23, %v125_v44  ;;  %v52_v23 = vmul.f32 %v50_v9, %v48_v7 }
  0x91   :  { %v130_v48 = vsel %vm128_vm1, %v129_v45, %v127_v47  ;;  %v134_v49 = vmul.f32 0.5, %v133_v46  ;;  %v186_v47 = vsub.f32 %v158_v39, %v574_v16 }
  0x92   :  { %v206_v50 = vperm.slane %v130_v48, 1  ;;  %v199_v51 = vperm.slane %v130_v48, 0  ;;  %v213_v57 = vperm.slane %v130_v48, 2  ;;  %v220_v61 = vperm.slane %v130_v48, 3 }
  0x93   :  { %v135_v52 = vsub.f32 1.5, %v134_v49  ;;  %v227_v62 = vperm.slane %v130_v48, 4  ;;  %v234_v3 = vperm.slane %v130_v48, 5  ;;  %v241_v4 = vperm.slane %v130_v48, 6 }
  0x94   :  { %211 = vperm.xlu1 %529, %v206_v50   ;;  %204 = vperm.xlu2 %528, %v199_v51   ;;  %v54_v20 = vadd.f32 %v52_v23, %v569_v31 }
  0x95   :  { %v136_v53 = vmul.f32 %v534_v41, %v135_v52 }
  0x96   :  { %v586_v33 = vadd.f32 %v65_v25, %v54_v20 }
  0x97   :  { %v137_v54 = vmul.f32 %v136_v53, %v118_v36 }
  0x98   :  { %v153_v31 = vrot.slane %v586_v33, 3  ;;  %v152_v44 = vrot.slane %v586_v33, 2  ;;  %v151_v52 = vrot.slane %v586_v33, 1  ;;  %v164_v19 = vperm.slane %v586_v33, 0 }
  0x99   :  { %v139_v56 = vsel %vm138_vm2, %v118_v36, %v137_v54  ;;  %v147_v36 = vrot.slane %v574_v16, 3  ;;  %v154_v27 = vrot.slane %v586_v33, 4  ;;  %v155_v20 = vrot.slane %v586_v33, 5 }
  0x9a   :  { %v142_v58 = vsel %vm140_vm3, %v141_v55, %v139_v56  ;;  %v167_v50 = vperm.slane %v153_v31, 0 }
  0x9b   :  { %v262_v59 = vperm.slane %v142_v58, 2  ;;  %v255_v60 = vperm.slane %v142_v58, 1  ;;  %v248_v63 = vperm.slane %v142_v58, 0  ;;  %v269_v0 = vperm.slane %v142_v58, 3 }
  0x9c   :  { %218 = vperm.xlu2 %528, %v213_v57   ;;  %v283_v1 = vperm.slane %v142_v58, 5  ;;  %v276_v2 = vperm.slane %v142_v58, 4  ;;  %v290_v5 = vperm.slane %v142_v58, 6  ;;  %v160_v40 = vperm.slane %v147_v36, 0 }
  0x9d   :  { %267 = vperm.xlu1 %529, %v262_v59   ;;  %260 = vperm.xlu0 %530, %v255_v60   ;;  %v162_v57 = vperm.slane %v149_v43, 0  ;;  %v166_v58 = vperm.slane %v152_v44, 0 }
  0x9e   :  { %v188_v53 = vsub.f32 %v160_v40, %v574_v16 }
  0x9f   :  { %v194_v6 = vsub.f32 %v166_v58, %v586_v33 }
  0xa4   :  { %225 = vperm.xlu2 %528, %v220_v61   ;;  %v195_v61 = vsub.f32 %v167_v50, %v586_v33 }
  0xa5   :  { %232 = vperm.xlu0 %530, %v227_v62   ;;  %253 = vperm.xlu1 %529, %v248_v63   ;;  %v165_v62 = vperm.slane %v151_v52, 0  ;;  %v156_v63 = vrot.slane %v586_v33, 6 }
  0xa7   :  { %v193_v14 = vsub.f32 %v165_v62, %v586_v33 }
  0xac   :  { %274 = vperm.xlu2 %528, %v269_v0  }
  0xad   :  { %288 = vperm.xlu0 %530, %v283_v1   ;;  %281 = vperm.xlu1 %529, %v276_v2  }
  0xb4   :  { %239 = vperm.xlu2 %528, %v234_v3   ;;  %v148_v3 = vrot.slane %v574_v16, 4 }
  0xb5   :  { %246 = vperm.xlu1 %529, %v241_v4  }
  0xbc   :  { %295 = vperm.xlu2 %528, %v290_v5   ;;  %v190_v5 = vsub.f32 %v162_v57, %v574_v16 }
  0xee   :  { %v205_v12 = vpop.permute.xlu2 %204 }
  0xef   :  { %v298_v24 = vmul.f32 %v577_v18, %v205_v12 }
  0xf1   :  { %v312_v29 = vadd.f32 %v298_v24, %v185_v26  ;;  %v161_v24 = vperm.slane %v148_v3, 0 }
  0xf3   :  { %v326_v37 = vadd.f32 %v312_v29, %v589_v34 }
  0xf5   :  { %v340_v45 = vmax.f32 %v326_v37, 0.0  ;;  %v192_v37 = vsub.f32 %v164_v19, %v586_v33 }
  0xf6   :  { %v219_v17 = vpop.permute.xlu2 %218 }
  0xf7   :  { %v300_v30 = vmul.f32 %v577_v18, %v219_v17  ;;  %v355_v55 = vsel %vm354_vm4, %v340_v45, 0.0  ;;  %v170_v17 = vperm.slane %v156_v63, 0 }
  0xf8   :  { %v356_v0 = vrot.slane %v355_v55, 4 }
  0xf9   :  { %v314_v38 = vadd.f32 %v300_v30, %v187_v35  ;;  %v198_v36 = vsub.f32 %v170_v17, %v586_v33 }
  0xfa   :  { %v357_v21 = vadd.f32 %v356_v0, %v355_v55  ;;  %v453_v0 = vmax.f32 %v563_v8, 0.0 }
  0xfb   :  { %v328_v46 = vadd.f32 %v314_v38, %v589_v34 }
  0xfc   :  { %v358_v38 = vrot.slane %v357_v21, 2  ;;  %v645_v19 = vperm.slane %v453_v0, 4 }
  0xfd   :  { %v342_v56 = vmax.f32 %v328_v46, 0.0  ;;  %v168_v46 = vperm.slane %v154_v27, 0 }
  0xfe   :  { %v226_v28 = vpop.permute.xlu2 %225 }
  0xff   :  { %v301_v49 = vmul.f32 %v577_v18, %v226_v28  ;;  %v369_v4 = vsel %vm354_vm4, %v342_v56, 0.0  ;;  %v359_v56 = vadd.f32 %v358_v38, %v357_v21  ;;  %v196_v3 = vsub.f32 %v168_v46, %v586_v33 }
 0x100   :  { %v370_v25 = vrot.slane %v369_v4, 4 }
 0x101   :  { %v315_v59 = vadd.f32 %v301_v49, %v188_v53 }
 0x103   :  { %v329_v10 = vadd.f32 %v315_v59, %v589_v34  ;;  %v150_v59 = vrot.slane %v574_v16, 6 }
 0x105   :  { %v343_v28 = vmax.f32 %v329_v10, 0.0 }
 0x106   :  { %v212_v41 = vpop.permute.xlu1 %211  ;;  %v275_v42 = vpop.permute.xlu2 %274 }
 0x107   :  { %v299_v48 = vmul.f32 %v577_v18, %v212_v41  ;;  %v308_v54 = vmul.f32 %v577_v18, %v275_v42  ;;  %v189_v41 = vsub.f32 %v161_v24, %v574_v16 }
 0x109   :  { %v313_v51 = vadd.f32 %v299_v48, %v186_v47  ;;  %v322_v1 = vadd.f32 %v308_v54, %v195_v61  ;;  %v371_v47 = vadd.f32 %v370_v25, %v369_v4  ;;  %v376_v48 = vsel %vm354_vm4, %v343_v28, 0.0 }
 0x10b   :  { %v327_v60 = vadd.f32 %v313_v51, %v589_v34  ;;  %v336_v22 = vadd.f32 %v322_v1, %v589_v34  ;;  %v630_v51 = vperm.slane %v155_v20, 0  ;;  %v377_v1 = vrot.slane %v376_v48, 4 }
 0x10c   :  { %v372_v4 = vrot.slane %v371_v47, 2 }
 0x10d   :  { %v341_v11 = vmax.f32 %v327_v60, 0.0  ;;  %v350_v39 = vmax.f32 %v336_v22, 0.0  ;;  %v378_v21 = vadd.f32 %v377_v1, %v376_v48 }
 0x10e   :  { %v240_v2 = vpop.permute.xlu2 %239  ;;  %v373_v24 = vadd.f32 %v372_v4, %v371_v47 }
 0x10f   :  { %v268_v7 = vpop.permute.xlu1 %267  ;;  %v261_v9 = vpop.permute.xlu0 %260  ;;  %v303_v12 = vmul.f32 %v577_v18, %v240_v2  ;;  %v362_v29 = vsel %vm354_vm4, %v341_v11, 0.0  ;;  %v425_v57 = vsel %vm354_vm4, %v350_v39, 0.0  ;;  %v379_v38 = vrot.slane %v378_v21, 2 }
 0x110   :  { %v307_v13 = vmul.f32 %v577_v18, %v268_v7  ;;  %v306_v15 = vmul.f32 %v577_v18, %v261_v9  ;;  %v363_v42 = vrot.slane %v362_v29, 4  ;;  %v426_v9 = vrot.slane %v425_v57, 4 }
 0x111   :  { %v317_v30 = vadd.f32 %v303_v12, %v190_v5  ;;  %v197_v12 = vsub.f32 %v630_v51, %v586_v33 }
 0x112   :  { %v321_v23 = vadd.f32 %v307_v13, %v194_v6  ;;  %v320_v26 = vadd.f32 %v306_v15, %v193_v14  ;;  %v364_v60 = vadd.f32 %v363_v42, %v362_v29  ;;  %v360_v13 = vrot.slane %v359_v56, 1 }
 0x113   :  { %v331_v49 = vadd.f32 %v317_v30, %v589_v34  ;;  %v427_v20 = vadd.f32 %v426_v9, %v425_v57 }
 0x114   :  { %v335_v32 = vadd.f32 %v321_v23, %v589_v34  ;;  %v334_v35 = vadd.f32 %v320_v26, %v589_v34  ;;  %v365_v14 = vrot.slane %v364_v60, 2  ;;  %v163_v23 = vperm.slane %v150_v59, 0 }
 0x115   :  { %v345_v5 = vmax.f32 %v331_v49, 0.0  ;;  %v428_v46 = vrot.slane %v427_v20, 2 }
 0x116   :  { %v349_v31 = vmax.f32 %v335_v32, 0.0  ;;  %v296_v40 = vpop.permute.xlu2 %295  ;;  %v348_v43 = vmax.f32 %v334_v35, 0.0  ;;  %v650_v32 = vadd.f32 %v360_v13, %v359_v56  ;;  %v366_v35 = vadd.f32 %v365_v14, %v364_v60 }
 0x117   :  { %v311_v44 = vmul.f32 %v577_v18, %v296_v40  ;;  %v254_v45 = vpop.permute.xlu1 %253  ;;  %v233_v50 = vpop.permute.xlu0 %232  ;;  %v390_v25 = vsel %vm354_vm4, %v345_v5, 0.0  ;;  %v429_v0 = vadd.f32 %v428_v46, %v427_v20 }
 0x118   :  { %v418_v52 = vsel %vm354_vm4, %v349_v31, 0.0  ;;  %v411_v53 = vsel %vm354_vm4, %v348_v43, 0.0  ;;  %v305_v55 = vmul.f32 %v577_v18, %v254_v45  ;;  %v302_v63 = vmul.f32 %v577_v18, %v233_v50 }
 0x119   :  { %v325_v54 = vadd.f32 %v311_v44, %v198_v36  ;;  %v412_v58 = vrot.slane %v411_v53, 4  ;;  %v419_v2 = vrot.slane %v418_v52, 4  ;;  %v391_v39 = vrot.slane %v390_v25, 4 }
 0x11a   :  { %v319_v62 = vadd.f32 %v305_v55, %v192_v37  ;;  %v316_v7 = vadd.f32 %v302_v63, %v189_v41  ;;  %v191_v44 = vsub.f32 %v163_v23, %v574_v16  ;;  %v374_v45 = vrot.slane %v373_v24, 1 }
 0x11b   :  { %v339_v61 = vadd.f32 %v325_v54, %v589_v34  ;;  %v413_v10 = vadd.f32 %v412_v58, %v411_v53  ;;  %v420_v22 = vadd.f32 %v419_v2, %v418_v52  ;;  %v455_v50 = vsub.f32 %v650_v32, %v645_v19 }
 0x11c   :  { %v333_v6 = vadd.f32 %v319_v62, %v589_v34  ;;  %v330_v8 = vadd.f32 %v316_v7, %v589_v34  ;;  %v367_v51 = vrot.slane %v366_v35, 1  ;;  %v380_v55 = vadd.f32 %v379_v38, %v378_v21 }
 0x11d   :  { %v353_v11 = vmax.f32 %v339_v61, 0.0  ;;  %v414_v28 = vrot.slane %v413_v10, 2  ;;  %v421_v31 = vrot.slane %v420_v22, 2  ;;  %v392_v56 = vadd.f32 %v391_v39, %v390_v25 }
 0x11e   :  { %v347_v15 = vmax.f32 %v333_v6, 0.0  ;;  %v344_v27 = vmax.f32 %v330_v8, 0.0  ;;  %v375_v63 = vadd.f32 %v374_v45, %v373_v24  ;;  %v381_v13 = vrot.slane %v380_v55, 1 }
 0x11f   :  { %v282_v17 = vpop.permute.xlu1 %281  ;;  %v446_v29 = vsel %vm354_vm4, %v353_v11, 0.0  ;;  %v415_v47 = vadd.f32 %v414_v28, %v413_v10  ;;  %v289_v49 = vpop.permute.xlu0 %288  ;;  %v422_v57 = vadd.f32 %v421_v31, %v420_v22  ;;  %v393_v7 = vrot.slane %v392_v56, 2 }
 0x120   :  { %v404_v26 = vsel %vm354_vm4, %v347_v15, 0.0  ;;  %v383_v36 = vsel %vm354_vm4, %v344_v27, 0.0  ;;  %v309_v37 = vmul.f32 %v577_v18, %v282_v17  ;;  %v447_v41 = vrot.slane %v446_v29, 4 }
 0x121   :  { %v405_v30 = vrot.slane %v404_v26, 4  ;;  %v384_v42 = vrot.slane %v383_v36, 4  ;;  %v310_v62 = vmul.f32 %v577_v18, %v289_v49  ;;  %v416_v1 = vrot.slane %v415_v47, 1 }
 0x122   :  { %v323_v43 = vadd.f32 %v309_v37, %v196_v3  ;;  %v448_v59 = vadd.f32 %v447_v41, %v446_v29  ;;  %v368_v3 = vadd.f32 %v367_v51, %v366_v35  ;;  %v423_v14 = vrot.slane %v422_v57, 1 }
 0x123   :  { %v406_v40 = vadd.f32 %v405_v30, %v404_v26  ;;  %v385_v52 = vadd.f32 %v384_v42, %v383_v36  ;;  %v324_v6 = vadd.f32 %v310_v62, %v197_v12  ;;  %v457_v17 = vsub.f32 %v375_v63, %v645_v19 }
 0x124   :  { %v337_v53 = vadd.f32 %v323_v43, %v589_v34  ;;  %v449_v15 = vrot.slane %v448_v59, 2  ;;  %v417_v21 = vadd.f32 %v416_v1, %v415_v47  ;;  %v456_v23 = vsub.f32 %v368_v3, %v645_v19 }
 0x125   :  { %v407_v48 = vrot.slane %v406_v40, 2  ;;  %v386_v60 = vrot.slane %v385_v52, 2  ;;  %v338_v8 = vadd.f32 %v324_v6, %v589_v34  ;;  %v430_v12 = vrot.slane %v429_v0, 1 }
 0x126   :  { %v351_v61 = vmax.f32 %v337_v53, 0.0  ;;  %v394_v26 = vadd.f32 %v393_v7, %v392_v56  ;;  %v382_v29 = vadd.f32 %v381_v13, %v380_v55  ;;  %v424_v30 = vadd.f32 %v423_v14, %v422_v57 }
 0x127   :  { %v247_v54 = vpop.permute.xlu1 %246  ;;  %v408_v58 = vadd.f32 %v407_v48, %v406_v40  ;;  %v387_v4 = vadd.f32 %v386_v60, %v385_v52  ;;  %v352_v25 = vmax.f32 %v338_v8, 0.0  ;;  %v450_v35 = vadd.f32 %v449_v15, %v448_v59 }
 0x128   :  { %v304_v2 = vmul.f32 %v577_v18, %v247_v54  ;;  %v432_v5 = vsel %vm354_vm4, %v351_v61, 0.0  ;;  %v463_v37 = vsub.f32 %v417_v21, %v645_v19  ;;  %v483_v40 = vrot.slane %v456_v23, 7 }
 0x129   :  { %v409_v9 = vrot.slane %v408_v58, 1  ;;  %v433_v10 = vrot.slane %v432_v5, 4  ;;  %v388_v24 = vrot.slane %v387_v4, 1  ;;  %v439_v36 = vsel %vm354_vm4, %v352_v25, 0.0 }
 0x12a   :  { %v318_v11 = vadd.f32 %v304_v2, %v191_v44  ;;  %v440_v39 = vrot.slane %v439_v36, 4  ;;  %v431_v41 = vadd.f32 %v430_v12, %v429_v0  ;;  %v395_v44 = vrot.slane %v394_v26, 1 }
 0x12b   :  { %v434_v22 = vadd.f32 %v433_v10, %v432_v5  ;;  %v410_v27 = vadd.f32 %v409_v9, %v408_v58  ;;  %v389_v42 = vadd.f32 %v388_v24, %v387_v4  ;;  %v485_v48 = vrot.slane %v457_v17, 6 }
 0x12c   :  { %v332_v18 = vadd.f32 %v318_v11, %v589_v34  ;;  %v441_v47 = vadd.f32 %v440_v39, %v439_v36  ;;  %v464_v49 = vsub.f32 %v424_v30, %v645_v19  ;;  %v451_v51 = vrot.slane %v450_v35, 1 }
 0x12d   :  { %v435_v20 = vrot.slane %v434_v22, 2  ;;  %v462_v45 = vsub.f32 %v410_v27, %v645_v19  ;;  %v458_v53 = vsub.f32 %v382_v29, %v645_v19  ;;  %v495_v54 = vrot.slane %v463_v37, 7 }
 0x12e   :  { %v346_v28 = vmax.f32 %v332_v18, 0.0  ;;  %v442_v56 = vrot.slane %v441_v47, 2  ;;  %v484_v57 = vsel %vm77_vm5, %v483_v40, %v455_v50  ;;  %v465_v58 = vsub.f32 %v431_v41, %v645_v19 }
 0x12f   :  { %v436_v38 = vadd.f32 %v435_v20, %v434_v22  ;;  %v459_v59 = vsub.f32 %v389_v42, %v645_v19  ;;  %v396_v61 = vadd.f32 %v395_v44, %v394_v26  ;;  %v496_v62 = vsel %vm77_vm5, %v495_v54, %v462_v45 }
 0x130   :  { %v397_v31 = vsel %vm354_vm4, %v346_v28, 0.0  ;;  %v443_v0 = vadd.f32 %v442_v56, %v441_v47  ;;  %v497_v1 = vrot.slane %v464_v49, 6  ;;  %v452_v2 = vadd.f32 %v451_v51, %v450_v35 }
 0x131   :  { %v398_v43 = vrot.slane %v397_v31, 4  ;;  %v437_v46 = vrot.slane %v436_v38, 1  ;;  %v486_v4 = vsel %vm78_vm6, %v485_v48, %v484_v57  ;;  %v489_v5 = vrot.slane %v459_v59, 4 }
 0x132   :  { %v444_v32 = vrot.slane %v443_v0, 1  ;;  %v498_v50 = vsel %vm78_vm6, %v497_v1, %v496_v62  ;;  %v487_v9 = vrot.slane %v458_v53, 5  ;;  %v499_v10 = vrot.slane %v465_v58, 5 }
 0x133   :  { %v399_v52 = vadd.f32 %v398_v43, %v397_v31  ;;  %v438_v55 = vadd.f32 %v437_v46, %v436_v38  ;;  %v460_v11 = vsub.f32 %v396_v61, %v645_v19  ;;  %v468_v14 = vsub.f32 %v452_v2, %v645_v19 }
 0x134   :  { %v445_v13 = vadd.f32 %v444_v32, %v443_v0  ;;  %v70_v15 = vadd.f32 %v589_v34, %v586_v33  ;;  %v488_v17 = vsel %vm80_vm7, %v487_v9, %v486_v4  ;;  %v500_v21 = vsel %vm80_vm7, %v499_v10, %v498_v50 }
 0x135   :  { %v400_v60 = vrot.slane %v399_v52, 2  ;;  %v466_v63 = vsub.f32 %v438_v55, %v645_v19  ;;  %v69_v18 = vadd.f32 %v589_v34, %v574_v16  ;;  %v490_v23 = vsel %vm82_vm8, %v489_v5, %v488_v17 }
 0x136   :  { %v467_v22 = vsub.f32 %v445_v13, %v645_v19  ;;  %v491_v25 = vrot.slane %v460_v11, 3  ;;  %v505_v27 = vrot.slane %v468_v14, 2  ;;  %v72_v33 = vmax.f32 %v70_v15, 0.0 }
 0x137   :  { %v401_v3 = vadd.f32 %v400_v60, %v399_v52  ;;  %v501_v6 = vrot.slane %v466_v63, 4  ;;  %v71_v29 = vmax.f32 %v69_v18, 0.0 }
 0x138   :  { %v503_v26 = vrot.slane %v467_v22, 3  ;;  %v492_v30 = vsel %vm84_vm9, %v491_v25, %v490_v23 }
 0x139   :  { %v402_v7 = vrot.slane %v401_v3, 1  ;;  %v502_v12 = vsel %vm82_vm8, %v501_v6, %v500_v21 }
 0x13a   :  { %v504_v28 = vsel %vm84_vm9, %v503_v26, %v502_v12 }
 0x13b   :  { %v403_v8 = vadd.f32 %v402_v7, %v401_v3  ;;  %v506_v35 = vsel %vm86_vm10, %v505_v27, %v504_v28 }
 0x13c   :  { %v511_v34 = vsel %vm509_vm11, %v72_v33, %v506_v35 }
 0x13d   :  { %v461_v24 = vsub.f32 %v403_v8, %v645_v19  ;;  %514 = vst.msk [vmem:[%s699_s2 + $0x8] sm:$0x7f] %vm512_vm12, %v511_v34 }
 0x13f   :  { %v493_v20 = vrot.slane %v461_v24, 2 }
 0x141   :  { %v494_v16 = vsel %vm86_vm10, %v493_v20, %v492_v30 }
 0x142   :  { %v510_v36 = vsel %vm509_vm11, %v71_v29, %v494_v16 }
 0x143   :  { %513 = vst.msk [vmem:[%s699_s2] sm:$0x7f] %vm512_vm12, %v510_v36 }

</bundles_post_ra>
